<compile_context>
chip_gen: v5e
topology: v5e:2x2
jax: 0.10.0
libtpu: 0.0.40
codegen_flags: <defaults>
</compile_context>

<pallas_src>
import jax
import jax.numpy as jnp
from jax.experimental import pallas as pl
from jax.experimental.pallas import tpu as pltpu

# Logical dims of the PyTorch module.
BOARD_CELLS = 300
PIECE_DIM = 7
IN_DIM = BOARD_CELLS + 3 * PIECE_DIM            # 321
H1, H2, H3 = 256, 128, 64
OUT_DIM = 8

# Padded dims (numerically exact: padded weight rows/cols and bias tails are 0).
H3_PAD = 128        # third hidden 64 -> 128 so W3/W4 matmuls are lane-aligned.
OUT_PAD = 128       # lane-dense output block; W4/b4 cols 8..127 are zero.

M_TILE_MAX = 1024   # batch rows per grid step (amortizes ~0.35us step overhead).
MIN_TILE = 16       # bf16 packs 16 sublanes per vreg.


def _round_up(v, m):
    return -(-v // m) * m


def _tile_plan(b):
    """Pick (m_tile, b_pad) for a batch of b states."""
    m_tile = min(M_TILE_MAX, _round_up(b, MIN_TILE))
    # v7x megacore: keep >= 2 grid steps when halving still leaves big tiles,
    # so the "parallel" batch axis can shard across both TensorCores.
    if _round_up(b, m_tile) == m_tile and m_tile >= 512:
        m_tile = _round_up(m_tile // 2, MIN_TILE)
    b_pad = _round_up(b, m_tile)
    return m_tile, b_pad


def _mlp_kernel(board_ref, cur_ref, held_ref, next_ref,
                w1b_ref, w1c_ref, w1h_ref, w1n_ref, b1_ref,
                w2_ref, b2_ref,
                w3_ref, b3_ref,
                w4_ref, b4_ref,
                o_ref):
    bf16 = jnp.bfloat16
    # Layer 1: four partial dots (board + 3 piece one-hots), f32 accumulation.
    h = jnp.dot(board_ref[...].astype(bf16), w1b_ref[...],
                preferred_element_type=jnp.float32)
    h = h + jnp.dot(cur_ref[...].astype(bf16), w1c_ref[...],
                    preferred_element_type=jnp.float32)
    h = h + jnp.dot(held_ref[...].astype(bf16), w1h_ref[...],
                    preferred_element_type=jnp.float32)
    h = h + jnp.dot(next_ref[...].astype(bf16), w1n_ref[...],
                    preferred_element_type=jnp.float32)
    h = jnp.maximum(h + b1_ref[...], 0.0).astype(bf16)                     # ReLU
    # Layer 2.
    h = jnp.dot(h, w2_ref[...], preferred_element_type=jnp.float32) + b2_ref[...]
    h = jnp.maximum(h, 0.0).astype(bf16)                                   # ReLU
    # Dropout(0.2): identity in the eval/deterministic forward pass.
    # TODO(synk): training-mode dropout would need pltpu.prng_seed/prng_random_bits
    #             plus 1/(1-p)=1.25 scaling; do not reuse this kernel for training.
    # Layer 3 (hidden padded 64 -> 128 with zero cols; exact).
    h = jnp.dot(h, w3_ref[...], preferred_element_type=jnp.float32) + b3_ref[...]
    h = jnp.maximum(h, 0.0).astype(bf16)                                   # ReLU
    # Layer 4 (output padded 8 -> 128 with zero cols; exact).
    o_ref[...] = (jnp.dot(h, w4_ref[...], preferred_element_type=jnp.float32)
                  + b4_ref[...]).astype(o_ref.dtype)


def _const_spec(arr):
    # Full-array block with a constant index map: fetched once, stays resident
    # in VMEM across all batch grid steps.
    return pl.BlockSpec(arr.shape, lambda i: (0, 0))


@jax.jit
def tetris_state_evaluator_forward_batched(board_states, current_piece,
                                           held_piece, next_piece, params):
    """Batched forward: (B,30,10),(B,7),(B,7),(B,7) -> (B, 8) float32."""
    b = board_states.shape[0]
    # No (B,384) assembly round trip: board reshape is a free view; the raw
    # f32 inputs are fed straight into the kernel and cast to bf16 in-kernel.
    # (If the producer can hand over bf16/int8 boards, the dominant HBM read
    #  shrinks another 2-4x.)
    board = board_states.reshape(b, BOARD_CELLS).astype(jnp.float32)
    cur = current_piece.astype(jnp.float32)
    held = held_piece.astype(jnp.float32)
    nxt = next_piece.astype(jnp.float32)

    m_tile, b_pad = _tile_plan(b)
    pad = b_pad - b
    if pad:
        board = jnp.pad(board, ((0, pad), (0, 0)))
        cur = jnp.pad(cur, ((0, pad), (0, 0)))
        held = jnp.pad(held, ((0, pad), (0, 0)))
        nxt = jnp.pad(nxt, ((0, pad), (0, 0)))

    (w1b, w1c, w1h, w1n, b1), (w2, b2), (w3, b3), (w4, b4) = params
    weight_ops = [w1b, w1c, w1h, w1n, b1, w2, b2, w3, b3, w4, b4]

    flops = 2 * b_pad * (BOARD_CELLS * H1 + 3 * PIECE_DIM * H1
                         + H1 * H2 + H2 * H3_PAD + H3_PAD * OUT_PAD)
    bytes_accessed = (b_pad * (BOARD_CELLS + 3 * PIECE_DIM) * 4      # f32 inputs
                      + sum(int(a.size) * a.dtype.itemsize for a in weight_ops)
                      + b_pad * OUT_PAD * 2)                         # bf16 output

    out = pl.pallas_call(
        _mlp_kernel,
        out_shape=jax.ShapeDtypeStruct((b_pad, OUT_PAD), jnp.bfloat16),
        grid=(b_pad // m_tile,),
        in_specs=[pl.BlockSpec((m_tile, BOARD_CELLS), lambda i: (i, 0)),
                  pl.BlockSpec((m_tile, PIECE_DIM), lambda i: (i, 0)),
                  pl.BlockSpec((m_tile, PIECE_DIM), lambda i: (i, 0)),
                  pl.BlockSpec((m_tile, PIECE_DIM), lambda i: (i, 0))]
                 + [_const_spec(a) for a in weight_ops],
        out_specs=pl.BlockSpec((m_tile, OUT_PAD), lambda i: (i, 0)),
        compiler_params=pltpu.CompilerParams(
            dimension_semantics=("parallel",)),   # v7x: shard batch across TCs
        cost_estimate=pl.CostEstimate(flops=flops, transcendentals=0,
                                      bytes_accessed=bytes_accessed),
    )(board, cur, held, nxt, *weight_ops)

    # Padded batch rows are bias-only garbage: the consumer-side slice (fused
    # here under jit, reading bf16) keeps only the real rows / 8 logical lanes.
    return out[:b, :OUT_DIM].astype(jnp.float32)


def tetris_state_evaluator_forward(board_state, current_piece, held_piece,
                                   next_piece, params):
    """Single-state forward, identical in semantics to the PyTorch module."""
    out = tetris_state_evaluator_forward_batched(
        board_state[None], current_piece[None], held_piece[None],
        next_piece[None], params)
    return out[0]


def init_params(key):
    """Xavier-uniform weights / zero biases (as nn.init.xavier_uniform_ /
    nn.init.zeros_), stored (in, out) in bf16, split + zero-padded to the
    kernel's lane-friendly layout.  Padded bias entries MUST stay zero."""
    logical = [(IN_DIM, H1), (H1, H2), (H2, H3), (H3, OUT_DIM)]
    ws = []
    for fan_in, fan_out in logical:
        key, sub = jax.random.split(key)
        bound = (6.0 / (fan_in + fan_out)) ** 0.5
        ws.append(jax.random.uniform(sub, (fan_in, fan_out), dtype=jnp.float32,
                                     minval=-bound, maxval=bound))
    w1, w2, w3, w4 = ws
    bf16 = jnp.bfloat16

    # Layer 1 split along input features: board rows, then the 3 piece blocks.
    w1b = w1[:BOARD_CELLS].astype(bf16)                                   # (300, 256)
    w1c = w1[BOARD_CELLS:BOARD_CELLS + PIECE_DIM].astype(bf16)            # (7, 256)
    w1h = w1[BOARD_CELLS + PIECE_DIM:BOARD_CELLS + 2 * PIECE_DIM].astype(bf16)
    w1n = w1[BOARD_CELLS + 2 * PIECE_DIM:].astype(bf16)
    b1 = jnp.zeros((1, H1), jnp.float32)
    b2 = jnp.zeros((1, H2), jnp.float32)
    # Layer 3: pad 64 -> 128 output cols with zeros (b3 tail zero).
    w3p = jnp.pad(w3, ((0, 0), (0, H3_PAD - H3))).astype(bf16)            # (128, 128)
    b3 = jnp.zeros((1, H3_PAD), jnp.float32)
    # Layer 4: zero rows for padded hidden lanes, zero cols beyond 8 outputs.
    w4p = jnp.pad(w4, ((0, H3_PAD - H3), (0, OUT_PAD - OUT_DIM))).astype(bf16)
    b4 = jnp.zeros((1, OUT_PAD), jnp.float32)

    return ((w1b, w1c, w1h, w1n, b1),
            (w2.astype(bf16), b2),
            (w3p, b3),
            (w4p, b4))


def _reference(board_states, current_piece, held_piece, next_piece, params):
    """Pure-JAX reference with the same bf16-weight / f32-accumulation path."""
    (w1b, w1c, w1h, w1n, b1), (w2, b2), (w3, b3), (w4, b4) = params
    bnum = board_states.shape[0]
    bf16 = jnp.bfloat16
    board = board_states.reshape(bnum, BOARD_CELLS).astype(bf16)
    h = (jnp.dot(board, w1b, preferred_element_type=jnp.float32)
         + jnp.dot(current_piece.astype(bf16), w1c, preferred_element_type=jnp.float32)
         + jnp.dot(held_piece.astype(bf16), w1h, preferred_element_type=jnp.float32)
         + jnp.dot(next_piece.astype(bf16), w1n, preferred_element_type=jnp.float32)
         + b1)
    h = jnp.maximum(h, 0.0).astype(bf16)
    h = jnp.maximum(jnp.dot(h, w2, preferred_element_type=jnp.float32) + b2, 0.0).astype(bf16)
    h = jnp.maximum(jnp.dot(h, w3, preferred_element_type=jnp.float32) + b3, 0.0).astype(bf16)
    out = (jnp.dot(h, w4, preferred_element_type=jnp.float32) + b4).astype(bf16)
    return out[:, :OUT_DIM].astype(jnp.float32)


if __name__ == "__main__":
    key = jax.random.PRNGKey(0)
    key, k_board, k_cur, k_held, k_next = jax.random.split(key, 5)

    # Small deterministic batch of states consistent with the module's forward:
    # 30x10 boards (300 cells) and three 7-dim one-hot piece vectors.
    B = 4
    board_states = (jax.random.uniform(k_board, (B, 30, 10)) > 0.5).astype(jnp.float32)
    current_piece = jax.nn.one_hot(jax.random.randint(k_cur, (B,), 0, 7), 7,
                                   dtype=jnp.float32)
    held_piece = jax.nn.one_hot(jax.random.randint(k_held, (B,), 0, 7), 7,
                                dtype=jnp.float32)
    next_piece = jax.nn.one_hot(jax.random.randint(k_next, (B,), 0, 7), 7,
                                dtype=jnp.float32)

    params = init_params(key)

    # Batched kernel call.
    out = tetris_state_evaluator_forward_batched(
        board_states, current_piece, held_piece, next_piece, params)
    out = jax.block_until_ready(out)
    assert out.shape == (B, OUT_DIM) and out.dtype == jnp.float32

    # Single-state API (matches the PyTorch forward signature exactly).
    single = tetris_state_evaluator_forward(
        board_states[0], current_piece[0], held_piece[0], next_piece[0], params)
    single = jax.block_until_ready(single)
    assert single.shape == (OUT_DIM,) and single.dtype == jnp.float32

    # Reference check (same precision path).
    ref = _reference(board_states, current_piece, held_piece, next_piece, params)
    assert jnp.allclose(out, ref, atol=2e-2, rtol=2e-2)
    assert jnp.allclose(single, ref[0], atol=2e-2, rtol=2e-2)

    print("KERNEL_OK")
</pallas_src>

<mosaic_0001>
module attributes {stable_mosaic.version = 11 : i64} {
  func.func @_mlp_kernel(%arg0: i32, %arg1: memref<16x300xf32, #tpu.memory_space<vmem>>, %arg2: memref<16x7xf32, #tpu.memory_space<vmem>>, %arg3: memref<16x7xf32, #tpu.memory_space<vmem>>, %arg4: memref<16x7xf32, #tpu.memory_space<vmem>>, %arg5: memref<300x256xbf16, #tpu.memory_space<vmem>>, %arg6: memref<7x256xbf16, #tpu.memory_space<vmem>>, %arg7: memref<7x256xbf16, #tpu.memory_space<vmem>>, %arg8: memref<7x256xbf16, #tpu.memory_space<vmem>>, %arg9: memref<1x256xf32, #tpu.memory_space<vmem>>, %arg10: memref<256x128xbf16, #tpu.memory_space<vmem>>, %arg11: memref<1x128xf32, #tpu.memory_space<vmem>>, %arg12: memref<128x128xbf16, #tpu.memory_space<vmem>>, %arg13: memref<1x128xf32, #tpu.memory_space<vmem>>, %arg14: memref<128x128xbf16, #tpu.memory_space<vmem>>, %arg15: memref<1x128xf32, #tpu.memory_space<vmem>>, %arg16: memref<16x128xbf16, #tpu.memory_space<vmem>>) attributes {dimension_semantics = [#tpu.dimension_semantics<parallel>], iteration_bounds = array<i64: 1>, scalar_prefetch = 0 : i64, scratch_operands = 0 : i64, tpu.core_type = #tpu.core_type<tc>, window_params = [{transform_indices = @transform_0, window_bounds = array<i64: 16, 300>}, {transform_indices = @transform_1, window_bounds = array<i64: 16, 7>}, {transform_indices = @transform_2, window_bounds = array<i64: 16, 7>}, {transform_indices = @transform_3, window_bounds = array<i64: 16, 7>}, {pipeline_mode = #tpu.pipeline_mode<synchronous>, transform_indices = @transform_4, window_bounds = array<i64: 300, 256>}, {pipeline_mode = #tpu.pipeline_mode<synchronous>, transform_indices = @transform_5, window_bounds = array<i64: 7, 256>}, {pipeline_mode = #tpu.pipeline_mode<synchronous>, transform_indices = @transform_6, window_bounds = array<i64: 7, 256>}, {pipeline_mode = #tpu.pipeline_mode<synchronous>, transform_indices = @transform_7, window_bounds = array<i64: 7, 256>}, {pipeline_mode = #tpu.pipeline_mode<synchronous>, transform_indices = @transform_8, window_bounds = array<i64: 1, 256>}, {pipeline_mode = #tpu.pipeline_mode<synchronous>, transform_indices = @transform_9, window_bounds = array<i64: 256, 128>}, {pipeline_mode = #tpu.pipeline_mode<synchronous>, transform_indices = @transform_10, window_bounds = array<i64: 1, 128>}, {pipeline_mode = #tpu.pipeline_mode<synchronous>, transform_indices = @transform_11, window_bounds = array<i64: 128, 128>}, {pipeline_mode = #tpu.pipeline_mode<synchronous>, transform_indices = @transform_12, window_bounds = array<i64: 1, 128>}, {pipeline_mode = #tpu.pipeline_mode<synchronous>, transform_indices = @transform_13, window_bounds = array<i64: 128, 128>}, {pipeline_mode = #tpu.pipeline_mode<synchronous>, transform_indices = @transform_14, window_bounds = array<i64: 1, 128>}, {transform_indices = @transform_15, window_bounds = array<i64: 16, 128>}]} {
    %c0 = arith.constant 0 : index
    %c0_0 = arith.constant 0 : index
    %0 = vector.load %arg1[%c0, %c0_0] : memref<16x300xf32, #tpu.memory_space<vmem>>, vector<16x300xf32>
    %1 = arith.truncf %0 : vector<16x300xf32> to vector<16x300xbf16>
    %c0_1 = arith.constant 0 : index
    %c0_2 = arith.constant 0 : index
    %2 = vector.load %arg5[%c0_1, %c0_2] : memref<300x256xbf16, #tpu.memory_space<vmem>>, vector<300x256xbf16>
    %cst = arith.constant dense<0.000000e+00> : vector<16x256xf32>
    %3 = tpu.matmul %1, %2, %cst {dimension_numbers = #tpu.dot_dimension_numbers<[1], [0], [0], [1], [0, 0, 1, 1], [], []>} : vector<16x300xbf16>, vector<300x256xbf16>, vector<16x256xf32> -> vector<16x256xf32>
    %c0_3 = arith.constant 0 : index
    %c0_4 = arith.constant 0 : index
    %4 = vector.load %arg2[%c0_3, %c0_4] : memref<16x7xf32, #tpu.memory_space<vmem>>, vector<16x7xf32>
    %5 = arith.truncf %4 : vector<16x7xf32> to vector<16x7xbf16>
    %c0_5 = arith.constant 0 : index
    %c0_6 = arith.constant 0 : index
    %6 = vector.load %arg6[%c0_5, %c0_6] : memref<7x256xbf16, #tpu.memory_space<vmem>>, vector<7x256xbf16>
    %cst_7 = arith.constant dense<0.000000e+00> : vector<16x256xf32>
    %7 = tpu.matmul %5, %6, %cst_7 {dimension_numbers = #tpu.dot_dimension_numbers<[1], [0], [0], [1], [0, 0, 1, 1], [], []>} : vector<16x7xbf16>, vector<7x256xbf16>, vector<16x256xf32> -> vector<16x256xf32>
    %8 = arith.addf %3, %7 : vector<16x256xf32>
    %c0_8 = arith.constant 0 : index
    %c0_9 = arith.constant 0 : index
    %9 = vector.load %arg3[%c0_8, %c0_9] : memref<16x7xf32, #tpu.memory_space<vmem>>, vector<16x7xf32>
    %10 = arith.truncf %9 : vector<16x7xf32> to vector<16x7xbf16>
    %c0_10 = arith.constant 0 : index
    %c0_11 = arith.constant 0 : index
    %11 = vector.load %arg7[%c0_10, %c0_11] : memref<7x256xbf16, #tpu.memory_space<vmem>>, vector<7x256xbf16>
    %cst_12 = arith.constant dense<0.000000e+00> : vector<16x256xf32>
    %12 = tpu.matmul %10, %11, %cst_12 {dimension_numbers = #tpu.dot_dimension_numbers<[1], [0], [0], [1], [0, 0, 1, 1], [], []>} : vector<16x7xbf16>, vector<7x256xbf16>, vector<16x256xf32> -> vector<16x256xf32>
    %13 = arith.addf %8, %12 : vector<16x256xf32>
    %c0_13 = arith.constant 0 : index
    %c0_14 = arith.constant 0 : index
    %14 = vector.load %arg4[%c0_13, %c0_14] : memref<16x7xf32, #tpu.memory_space<vmem>>, vector<16x7xf32>
    %15 = arith.truncf %14 : vector<16x7xf32> to vector<16x7xbf16>
    %c0_15 = arith.constant 0 : index
    %c0_16 = arith.constant 0 : index
    %16 = vector.load %arg8[%c0_15, %c0_16] : memref<7x256xbf16, #tpu.memory_space<vmem>>, vector<7x256xbf16>
    %cst_17 = arith.constant dense<0.000000e+00> : vector<16x256xf32>
    %17 = tpu.matmul %15, %16, %cst_17 {dimension_numbers = #tpu.dot_dimension_numbers<[1], [0], [0], [1], [0, 0, 1, 1], [], []>} : vector<16x7xbf16>, vector<7x256xbf16>, vector<16x256xf32> -> vector<16x256xf32>
    %18 = arith.addf %13, %17 : vector<16x256xf32>
    %c0_18 = arith.constant 0 : index
    %c0_19 = arith.constant 0 : index
    %19 = vector.load %arg9[%c0_18, %c0_19] : memref<1x256xf32, #tpu.memory_space<vmem>>, vector<1x256xf32>
    %20 = vector.broadcast %19 : vector<1x256xf32> to vector<16x256xf32>
    %21 = arith.addf %18, %20 : vector<16x256xf32>
    %cst_20 = arith.constant 0.000000e+00 : f32
    %22 = vector.broadcast %cst_20 : f32 to vector<16x256xf32>
    %23 = arith.maximumf %21, %22 : vector<16x256xf32>
    %24 = arith.truncf %23 : vector<16x256xf32> to vector<16x256xbf16>
    %c0_21 = arith.constant 0 : index
    %c0_22 = arith.constant 0 : index
    %25 = vector.load %arg10[%c0_21, %c0_22] : memref<256x128xbf16, #tpu.memory_space<vmem>>, vector<256x128xbf16>
    %cst_23 = arith.constant dense<0.000000e+00> : vector<16x128xf32>
    %26 = tpu.matmul %24, %25, %cst_23 {dimension_numbers = #tpu.dot_dimension_numbers<[1], [0], [0], [1], [0, 0, 1, 1], [], []>} : vector<16x256xbf16>, vector<256x128xbf16>, vector<16x128xf32> -> vector<16x128xf32>
    %c0_24 = arith.constant 0 : index
    %c0_25 = arith.constant 0 : index
    %27 = vector.load %arg11[%c0_24, %c0_25] : memref<1x128xf32, #tpu.memory_space<vmem>>, vector<1x128xf32>
    %28 = vector.broadcast %27 : vector<1x128xf32> to vector<16x128xf32>
    %29 = arith.addf %26, %28 : vector<16x128xf32>
    %cst_26 = arith.constant 0.000000e+00 : f32
    %30 = vector.broadcast %cst_26 : f32 to vector<16x128xf32>
    %31 = arith.maximumf %29, %30 : vector<16x128xf32>
    %32 = arith.truncf %31 : vector<16x128xf32> to vector<16x128xbf16>
    %c0_27 = arith.constant 0 : index
    %c0_28 = arith.constant 0 : index
    %33 = vector.load %arg12[%c0_27, %c0_28] : memref<128x128xbf16, #tpu.memory_space<vmem>>, vector<128x128xbf16>
    %cst_29 = arith.constant dense<0.000000e+00> : vector<16x128xf32>
    %34 = tpu.matmul %32, %33, %cst_29 {dimension_numbers = #tpu.dot_dimension_numbers<[1], [0], [0], [1], [0, 0, 1, 1], [], []>} : vector<16x128xbf16>, vector<128x128xbf16>, vector<16x128xf32> -> vector<16x128xf32>
    %c0_30 = arith.constant 0 : index
    %c0_31 = arith.constant 0 : index
    %35 = vector.load %arg13[%c0_30, %c0_31] : memref<1x128xf32, #tpu.memory_space<vmem>>, vector<1x128xf32>
    %36 = vector.broadcast %35 : vector<1x128xf32> to vector<16x128xf32>
    %37 = arith.addf %34, %36 : vector<16x128xf32>
    %cst_32 = arith.constant 0.000000e+00 : f32
    %38 = vector.broadcast %cst_32 : f32 to vector<16x128xf32>
    %39 = arith.maximumf %37, %38 : vector<16x128xf32>
    %40 = arith.truncf %39 : vector<16x128xf32> to vector<16x128xbf16>
    %c0_33 = arith.constant 0 : index
    %c0_34 = arith.constant 0 : index
    %41 = vector.load %arg14[%c0_33, %c0_34] : memref<128x128xbf16, #tpu.memory_space<vmem>>, vector<128x128xbf16>
    %cst_35 = arith.constant dense<0.000000e+00> : vector<16x128xf32>
    %42 = tpu.matmul %40, %41, %cst_35 {dimension_numbers = #tpu.dot_dimension_numbers<[1], [0], [0], [1], [0, 0, 1, 1], [], []>} : vector<16x128xbf16>, vector<128x128xbf16>, vector<16x128xf32> -> vector<16x128xf32>
    %c0_36 = arith.constant 0 : index
    %c0_37 = arith.constant 0 : index
    %43 = vector.load %arg15[%c0_36, %c0_37] : memref<1x128xf32, #tpu.memory_space<vmem>>, vector<1x128xf32>
    %44 = vector.broadcast %43 : vector<1x128xf32> to vector<16x128xf32>
    %45 = arith.addf %42, %44 : vector<16x128xf32>
    %46 = arith.truncf %45 : vector<16x128xf32> to vector<16x128xbf16>
    %c0_38 = arith.constant 0 : index
    %c0_39 = arith.constant 0 : index
    %47 = vector.load %arg16[%c0_38, %c0_39] : memref<16x128xbf16, #tpu.memory_space<vmem>>, vector<16x128xbf16>
    tpu.vector_store %arg16[%c0_38, %c0_39], %46 {strides = array<i32>} : memref<16x128xbf16, #tpu.memory_space<vmem>>, vector<16x128xbf16>,
    return
  }
  func.func @transform_0(%arg0: i32) -> (i32, i32) {
    %c0_i32 = arith.constant 0 : i32
    %c0_i32_0 = arith.constant 0 : i32
    return %arg0, %c0_i32 : i32, i32
  }
  func.func @transform_1(%arg0: i32) -> (i32, i32) {
    %c0_i32 = arith.constant 0 : i32
    %c0_i32_0 = arith.constant 0 : i32
    return %arg0, %c0_i32 : i32, i32
  }
  func.func @transform_2(%arg0: i32) -> (i32, i32) {
    %c0_i32 = arith.constant 0 : i32
    %c0_i32_0 = arith.constant 0 : i32
    return %arg0, %c0_i32 : i32, i32
  }
  func.func @transform_3(%arg0: i32) -> (i32, i32) {
    %c0_i32 = arith.constant 0 : i32
    %c0_i32_0 = arith.constant 0 : i32
    return %arg0, %c0_i32 : i32, i32
  }
  func.func @transform_4(%arg0: i32) -> (i32, i32) {
    %c0_i32 = arith.constant 0 : i32
    %c0_i32_0 = arith.constant 0 : i32
    %c0_i32_1 = arith.constant 0 : i32
    return %c0_i32, %c0_i32_0 : i32, i32
  }
  func.func @transform_5(%arg0: i32) -> (i32, i32) {
    %c0_i32 = arith.constant 0 : i32
    %c0_i32_0 = arith.constant 0 : i32
    %c0_i32_1 = arith.constant 0 : i32
    return %c0_i32, %c0_i32_0 : i32, i32
  }
  func.func @transform_6(%arg0: i32) -> (i32, i32) {
    %c0_i32 = arith.constant 0 : i32
    %c0_i32_0 = arith.constant 0 : i32
    %c0_i32_1 = arith.constant 0 : i32
    return %c0_i32, %c0_i32_0 : i32, i32
  }
  func.func @transform_7(%arg0: i32) -> (i32, i32) {
    %c0_i32 = arith.constant 0 : i32
    %c0_i32_0 = arith.constant 0 : i32
    %c0_i32_1 = arith.constant 0 : i32
    return %c0_i32, %c0_i32_0 : i32, i32
  }
  func.func @transform_8(%arg0: i32) -> (i32, i32) {
    %c0_i32 = arith.constant 0 : i32
    %c0_i32_0 = arith.constant 0 : i32
    %c0_i32_1 = arith.constant 0 : i32
    return %c0_i32, %c0_i32_0 : i32, i32
  }
  func.func @transform_9(%arg0: i32) -> (i32, i32) {
    %c0_i32 = arith.constant 0 : i32
    %c0_i32_0 = arith.constant 0 : i32
    %c0_i32_1 = arith.constant 0 : i32
    return %c0_i32, %c0_i32_0 : i32, i32
  }
  func.func @transform_10(%arg0: i32) -> (i32, i32) {
    %c0_i32 = arith.constant 0 : i32
    %c0_i32_0 = arith.constant 0 : i32
    %c0_i32_1 = arith.constant 0 : i32
    return %c0_i32, %c0_i32_0 : i32, i32
  }
  func.func @transform_11(%arg0: i32) -> (i32, i32) {
    %c0_i32 = arith.constant 0 : i32
    %c0_i32_0 = arith.constant 0 : i32
    %c0_i32_1 = arith.constant 0 : i32
    return %c0_i32, %c0_i32_0 : i32, i32
  }
  func.func @transform_12(%arg0: i32) -> (i32, i32) {
    %c0_i32 = arith.constant 0 : i32
    %c0_i32_0 = arith.constant 0 : i32
    %c0_i32_1 = arith.constant 0 : i32
    return %c0_i32, %c0_i32_0 : i32, i32
  }
  func.func @transform_13(%arg0: i32) -> (i32, i32) {
    %c0_i32 = arith.constant 0 : i32
    %c0_i32_0 = arith.constant 0 : i32
    %c0_i32_1 = arith.constant 0 : i32
    return %c0_i32, %c0_i32_0 : i32, i32
  }
  func.func @transform_14(%arg0: i32) -> (i32, i32) {
    %c0_i32 = arith.constant 0 : i32
    %c0_i32_0 = arith.constant 0 : i32
    %c0_i32_1 = arith.constant 0 : i32
    return %c0_i32, %c0_i32_0 : i32, i32
  }
  func.func @transform_15(%arg0: i32) -> (i32, i32) {
    %c0_i32 = arith.constant 0 : i32
    %c0_i32_0 = arith.constant 0 : i32
    return %arg0, %c0_i32 : i32, i32
  }
}

</mosaic_0001>

<bundles_post_ra>
// kernel: tetris_state_evaluator_forward_batched.1
= control target key start
LH: loop header
LB: loop body
LE: loop exit
PB: predicated region body
PF: predicated region fallthrough
CT: control target
= control target key end

     0   :  { %20 = vsyncpa [#allocation3], 0  ;;  %s1995_s0 = inlined_call_operand.vmem [shape: f32[16,300], index: 0, kind: input, shape index: {}]   ;;  %s1996_s1 = inlined_call_operand.vmem [shape: f32[16,7], index: 1, kind: input, shape index: {}]   ;;  %s1997_s2 = inlined_call_operand.vmem [shape: f32[16,7], index: 2, kind: input, shape index: {}]   ;;  %s1998_s3 = inlined_call_operand.vmem [shape: f32[16,7], index: 3, kind: input, shape index: {}]   ;;  %s1999_s4 = inlined_call_operand.vmem [shape: bf16[300,256], index: 4, kind: input, shape index: {}]   ;;  %s2000_s5 = inlined_call_operand.vmem [shape: bf16[7,256], index: 5, kind: input, shape index: {}]   ;;  %s2001_s6 = inlined_call_operand.hbm [shape: bf16[7,256], index: 6, kind: input, shape index: {}]   ;;  %s2002_s7 = inlined_call_operand.hbm [shape: bf16[7,256], index: 7, kind: input, shape index: {}]   ;;  %s2003_s8 = inlined_call_operand.hbm [shape: f32[1,256], index: 8, kind: input, shape index: {}]   ;;  %s2004_s9 = inlined_call_operand.vmem [shape: bf16[256,128], index: 9, kind: input, shape index: {}]   ;;  %s2005_s10 = inlined_call_operand.vmem [shape: f32[1,128], index: 10, kind: input, shape index: {}]   ;;  %s2006_s11 = inlined_call_operand.hbm [shape: bf16[128,128], index: 11, kind: input, shape index: {}]   ;;  %s2007_s12 = inlined_call_operand.hbm [shape: f32[1,128], index: 12, kind: input, shape index: {}]   ;;  %s2008_s13 = inlined_call_operand.hbm [shape: bf16[128,128], index: 13, kind: input, shape index: {}]   ;;  %s2009_s14 = inlined_call_operand.hbm [shape: f32[1,128], index: 14, kind: input, shape index: {}]   ;;  %s2010_s15 = inlined_call_operand.vmem [shape: bf16[16,128], index: 15, kind: output, shape index: {}]  }
   0x1   :  { %21 = vsyncpa [#allocation5], 0 }
   0x2   :  { %22 = vsyncpa [#allocation8], 0  ;;  %s52_s20 = sshll.u32 %s2002_s7, 4  ;;  %s53_s20 = int_to_ptr.hbm [resolvable:$true] %s52_s20 }
   0x3   :  { %23 = vsyncpa [#allocation11], 0  ;;  %s1541_s21 = smov [#allocation4]   ;;  %s77_s25 = sshll.u32 %s2006_s11, 4  ;;  %s78_s25 = int_to_ptr.hbm [resolvable:$true] %s77_s25 }
   0x4   :  { %s54_s22 = sshll.u32 %s1541_s21, 4  ;;  %s1542_s26 = smov [#allocation7]   ;;  %s55_s22 = int_to_ptr.vmem [resolvable:$true] %s54_s22 }
   0x5   :  { %57 = dma.hbm_to_vmem [thread:$0]  %s53_s20, 128, %s55_s22, [#allocation5]  }
   0x6   :  { %s79_s27 = sshll.u32 %s1542_s26, 4  ;;  %s1543_s28 = smov 64   ;;  %s80_s27 = int_to_ptr.vmem [resolvable:$true] %s79_s27 }
   0x7   :  { %s1544_s29 = smov 4   ;;  %s101_s7 = sshll.u32 %s2008_s13, 4  ;;  %s102_s7 = int_to_ptr.hbm [resolvable:$true] %s101_s7 }
   0x8   :  { %85 = dma.hbm_to_vmem [thread:$0]  %s78_s25, 1024, %s80_s27, [#allocation8], %s1543_s28, %s1543_s28, %s1544_s29  }
   0x9   :  { %s1545_s17 = smov [#allocation10]   ;;  %s41_s11 = sshll.u32 %s2001_s6, 4  ;;  %s42_s11 = int_to_ptr.hbm [resolvable:$true] %s41_s11 }
   0xa   :  { %s103_s18 = sshll.u32 %s1545_s17, 4  ;;  %s1546_s20 = smov [#allocation2]   ;;  %s104_s18 = int_to_ptr.vmem [resolvable:$true] %s103_s18 }
   0xb   :  { %109 = dma.hbm_to_vmem [thread:$0]  %s102_s7, 1024, %s104_s18, [#allocation11], %s1543_s28, %s1543_s28, %s1544_s29  }
   0xc   :  { %s43_s22 = sshll.u32 %s1546_s20, 4  ;;  %s63_s25 = sshll.u32 %s2003_s8, 4  ;;  %s44_s22 = int_to_ptr.vmem [resolvable:$true] %s43_s22  ;;  %s64_s25 = int_to_ptr.hbm [resolvable:$true] %s63_s25 }
   0xd   :  { %46 = dma.hbm_to_vmem [thread:$0]  %s42_s11, 128, %s44_s22, [#allocation3]  }
   0xe   :  { %s91_s27 = sshll.u32 %s2007_s12, 4  ;;  %s1547_s30 = smov [#allocation6]   ;;  %s92_s27 = int_to_ptr.hbm [resolvable:$true] %s91_s27 }
   0xf   :  { %s65_s16 = sshll.u32 %s1547_s30, 4  ;;  %s1548_s6 = smov [#allocation9]   ;;  %s66_s16 = int_to_ptr.vmem [resolvable:$true] %s65_s16 }
  0x10   :  { %68 = dma.hbm_to_vmem [thread:$0]  %s64_s25, 32, %s66_s16, [#allocation5]  }
  0x11   :  { %s93_s28 = sshll.u32 %s1548_s6, 4  ;;  %s115_s17 = sshll.u32 %s2009_s14, 4  ;;  %s94_s28 = int_to_ptr.vmem [resolvable:$true] %s93_s28  ;;  %s116_s17 = int_to_ptr.hbm [resolvable:$true] %s115_s17 }
  0x12   :  { %96 = dma.hbm_to_vmem [thread:$0]  %s92_s27, 16, %s94_s28, [#allocation8]  }
  0x13   :  { %s1549_s8 = smov [#allocation12]  }
  0x14   :  { %s117_s18 = sshll.u32 %s1549_s8, 4  ;;  %s118_s18 = int_to_ptr.vmem [resolvable:$true] %s117_s18 }
  0x15   :  { %120 = dma.hbm_to_vmem [thread:$0]  %s116_s17, 16, %s118_s18, [#allocation11]  }
  0x16   :  { %1533 = dma.done.wait [#allocation3], 128  }
  0x17   :  { %1534 = vsyncadd [#allocation3], 4294967168 }
  0x18   :  { %1535 = dma.done.wait [#allocation5], 160  }
  0x19   :  { %1536 = vsyncadd [#allocation5], 4294967136 }
  0x1a   :  { %1537 = dma.done.wait [#allocation8], 1040  }
  0x1b   :  { %1538 = vsyncadd [#allocation8], 4294966256 }
  0x1c   :  { %1539 = dma.done.wait [#allocation11], 1040  }
  0x1d   :  { %1540 = vsyncadd [#allocation11], 4294966256  ;;  %vm210_vm0 = vcmask 1042432   ;;  %vm211_vm1 = vcmask 1043456   ;;  %v1550_v0 = vmov 65535   ;;  %vm440_vm2 = vcmask 1045504  }
  0x1e   :  { %v212_v1 = vsel %vm210_vm0, 4294967295, %v1550_v0  ;;  %v1049_v2 = vld [vmem:[%s1999_s4 + $0x70] sm:$0xf]  ;;  %v1292_v3 = vld [vmem:[%s1999_s4 + $0x74] sm:$0xf0]  ;;  %v200_v7 = vld [vmem:[%s2000_s5] sm:$0xff] }
  0x1f   :  { %v1113_v4 = vld [vmem:[%s1999_s4 + $0xf0] sm:$0xf]  ;;  %v1050_v5 = vor.u32 %v1292_v3, %v1049_v2  ;;  %v1308_v6 = vld [vmem:[%s1999_s4 + $0xf4] sm:$0xf0]  ;;  %v1667_v8 = vsel %vm211_vm1, %v212_v1, 0  ;;  %v202_v11 = vunpack.c.l.b16 %v200_v7  ;;  %v203_v12 = vunpack.c.h.b16 %v200_v7  ;;  %v197_v35 = vld [vmem:[%s1996_s1] sm:$0xff] }
  0x20   :  { %v1041_v9 = vld [vmem:[%s1999_s4 + $0x60] sm:$0xf]  ;;  %v1114_v10 = vor.u32 %v1308_v6, %v1113_v4  ;;  %v1290_v13 = vld [vmem:[%s1999_s4 + $0x64] sm:$0xf0]  ;;  %v1291_v19 = vld [vmem:[%s1999_s4 + $0x74] sm:$0xf] }
  0x21   :  { %v1105_v14 = vld [vmem:[%s1999_s4 + $0xe0] sm:$0xf]  ;;  %v1306_v15 = vld [vmem:[%s1999_s4 + $0xe4] sm:$0xf0]  ;;  %447 = vmatpush.bf16.msra.mxu2 %v1050_v5  ;;  %v1042_v16 = vor.u32 %v1290_v13, %v1041_v9  ;;  %v204_v20 = vpack.c.b16 %v202_v11, %v202_v11  ;;  %v205_v21 = vpack.c.b16 %v203_v12, %v203_v12  ;;  %v1051_v23 = vld [vmem:[%s1999_s4 + $0x78] sm:$0xf0] }
  0x22   :  { %v1137_v17 = vld [vmem:[%s1999_s4 + $0x120] sm:$0xf]  ;;  %v1314_v18 = vld [vmem:[%s1999_s4 + $0x124] sm:$0x30]  ;;  %461 = vmatpush.bf16.msra.mxu3 %v1114_v10  ;;  %v1033_v24 = vld [vmem:[%s1999_s4 + $0x50] sm:$0xf]  ;;  %v1106_v26 = vor.u32 %v1306_v15, %v1105_v14  ;;  %v1054_v32 = vor.u32 %v1291_v19, %v1051_v23 }
  0x23   :  { %v1138_v22 = vor.u32 %v1314_v18, %v1137_v17  ;;  %v1288_v25 = vld [vmem:[%s1999_s4 + $0x54] sm:$0xf0]  ;;  %v1097_v27 = vld [vmem:[%s1999_s4 + $0xd0] sm:$0xf]  ;;  %v215_v29 = vand.u32 %v1667_v8, %v204_v20  ;;  %v218_v30 = vand.u32 %v1667_v8, %v205_v21  ;;  %v1289_v37 = vld [vmem:[%s1999_s4 + $0x64] sm:$0xf] }
  0x24   :  { %v1304_v28 = vld [vmem:[%s1999_s4 + $0xd4] sm:$0xf0]  ;;  %v1129_v33 = vld [vmem:[%s1999_s4 + $0x110] sm:$0xf]  ;;  %v1034_v36 = vor.u32 %v1288_v25, %v1033_v24  ;;  %v1043_v38 = vld [vmem:[%s1999_s4 + $0x68] sm:$0xf0] }
  0x25   :  { %v442_v31 = vsel %vm440_vm2, %v1138_v22, 0  ;;  %v1312_v34 = vld [vmem:[%s1999_s4 + $0x114] sm:$0xf0]  ;;  %448 = vmatpush.bf16.msra.mxu2 %v1042_v16  ;;  %227 = vmatpush.bf16.msra.mxu0 %v215_v29  ;;  %v1025_v39 = vld [vmem:[%s1999_s4 + $0x40] sm:$0xf]  ;;  %v198_v41 = vld [vmem:[%s1996_s1 + $0x8] sm:$0xff]  ;;  %v1098_v42 = vor.u32 %v1304_v28, %v1097_v27  ;;  %v1046_v47 = vor.u32 %v1289_v37, %v1043_v38 }
  0x26   :  { %241 = vmatpush.bf16.msra.mxu1 %v218_v30  ;;  %v1286_v40 = vld [vmem:[%s1999_s4 + $0x44] sm:$0xf0]  ;;  %vm206_vm3 = vcmask 56320   ;;  %462 = vmatpush.bf16.msra.mxu3 %v1106_v26  ;;  %v1130_v43 = vor.u32 %v1312_v34, %v1129_v33  ;;  %v1089_v44 = vld [vmem:[%s1999_s4 + $0xc0] sm:$0xf]  ;;  %v199_v46 = vpack.c.bf16 %v198_v41, %v197_v35  ;;  %v152_v19 = vld [vmem:[%s1995_s0 + $0x10] sm:$0xff] }
  0x27   :  { %v1302_v45 = vld [vmem:[%s1999_s4 + $0xc4] sm:$0xf0]  ;;  %v1121_v48 = vld [vmem:[%s1999_s4 + $0x100] sm:$0xf]  ;;  %v1287_v50 = vld [vmem:[%s1999_s4 + $0x54] sm:$0xf]  ;;  %v1026_v51 = vor.u32 %v1286_v40, %v1025_v39 }
  0x28   :  { %v1310_v49 = vld [vmem:[%s1999_s4 + $0x104] sm:$0xf0]  ;;  %989 = vmatmul.msk.bf16.vlgmr.msra.gmra.mxu0 %vm206_vm3, %v199_v46  ;;  %v1035_v52 = vld [vmem:[%s1999_s4 + $0x58] sm:$0xf0]  ;;  %v1307_v53 = vld [vmem:[%s1999_s4 + $0xf4] sm:$0xf]  ;;  %v1090_v57 = vor.u32 %v1302_v45, %v1089_v44 }
  0x29   :  { %480 = vmatpush.bf16.msrb.mxu0 %v442_v31  ;;  %449 = vmatpush.bf16.msra.mxu2 %v1034_v36  ;;  %v1115_v54 = vld [vmem:[%s1999_s4 + $0xf8] sm:$0xf0]  ;;  %v1017_v55 = vld [vmem:[%s1999_s4 + $0x30] sm:$0xf]  ;;  %v1284_v56 = vld [vmem:[%s1999_s4 + $0x34] sm:$0xf0]  ;;  %v1122_v58 = vor.u32 %v1310_v49, %v1121_v48  ;;  %v1038_v59 = vor.u32 %v1287_v50, %v1035_v52 }
  0x2a   :  { %489 = vmatpush.bf16.msrb.mxu1 %v1054_v32  ;;  %463 = vmatpush.bf16.msra.mxu3 %v1098_v42  ;;  %v1118_v60 = vor.u32 %v1307_v53, %v1115_v54  ;;  %v1081_v61 = vld [vmem:[%s1999_s4 + $0xb0] sm:$0xf]  ;;  %v1300_v62 = vld [vmem:[%s1999_s4 + $0xb4] sm:$0xf0]  ;;  %v1285_v63 = vld [vmem:[%s1999_s4 + $0x44] sm:$0xf]  ;;  %v1018_v0 = vor.u32 %v1284_v56, %v1017_v55 }
  0x2b   :  { %990 = vmatmul.msk.bf16.vlgmr.msra.gmra.mxu1 %vm206_vm3, %v199_v46  ;;  %v1027_v1 = vld [vmem:[%s1999_s4 + $0x48] sm:$0xf0]  ;;  %v1305_v2 = vld [vmem:[%s1999_s4 + $0xe4] sm:$0xf]  ;;  %v1009_v4 = vld [vmem:[%s1999_s4 + $0x20] sm:$0xf]  ;;  %v1082_v6 = vor.u32 %v1300_v62, %v1081_v61 }
  0x2c   :  { %v1107_v3 = vld [vmem:[%s1999_s4 + $0xe8] sm:$0xf0]  ;;  %v1282_v5 = vld [vmem:[%s1999_s4 + $0x24] sm:$0xf0]  ;;  %v1073_v7 = vld [vmem:[%s1999_s4 + $0xa0] sm:$0xf]  ;;  %v1030_v9 = vor.u32 %v1285_v63, %v1027_v1 }
  0x2d   :  { %481 = vmatpush.bf16.msrb.mxu0 %v1130_v43  ;;  %450 = vmatpush.bf16.msra.mxu2 %v1026_v51  ;;  %v1110_v10 = vor.u32 %v1305_v2, %v1107_v3  ;;  %v1298_v11 = vld [vmem:[%s1999_s4 + $0xa4] sm:$0xf0]  ;;  %v1283_v12 = vld [vmem:[%s1999_s4 + $0x34] sm:$0xf]  ;;  %v1019_v13 = vld [vmem:[%s1999_s4 + $0x38] sm:$0xf0]  ;;  %v1010_v14 = vor.u32 %v1282_v5, %v1009_v4 }
  0x2e   :  { %490 = vmatpush.bf16.msrb.mxu1 %v1046_v47  ;;  %464 = vmatpush.bf16.msra.mxu3 %v1090_v57  ;;  %v1303_v15 = vld [vmem:[%s1999_s4 + $0xd4] sm:$0xf]  ;;  %v1099_v16 = vld [vmem:[%s1999_s4 + $0xd8] sm:$0xf0]  ;;  %v1001_v17 = vld [vmem:[%s1999_s4 + $0x10] sm:$0xf]  ;;  %v1074_v21 = vor.u32 %v1298_v11, %v1073_v7  ;;  %v1022_v23 = vor.u32 %v1283_v12, %v1019_v13 }
  0x2f   :  { %v1280_v18 = vld [vmem:[%s1999_s4 + $0x14] sm:$0xf0]  ;;  %v155_v20 = vld [vmem:[%s1995_s0 + $0x28] sm:$0xff]  ;;  %v1065_v22 = vld [vmem:[%s1999_s4 + $0x90] sm:$0xf]  ;;  %vm436_vm4 = vcmask 359424   ;;  %v1102_v24 = vor.u32 %v1303_v15, %v1099_v16 }
  0x30   :  { %v1296_v25 = vld [vmem:[%s1999_s4 + $0x94] sm:$0xf0]  ;;  %v1281_v26 = vld [vmem:[%s1999_s4 + $0x24] sm:$0xf]  ;;  %v1011_v27 = vld [vmem:[%s1999_s4 + $0x28] sm:$0xf0]  ;;  %v1002_v28 = vor.u32 %v1280_v18, %v1001_v17  ;;  %v1836_v31 = vpack.c.bf16 %v155_v20, %v152_v19 }
  0x31   :  { %482 = vmatpush.bf16.msrb.mxu0 %v1122_v58  ;;  %451 = vmatpush.bf16.msra.mxu2 %v1018_v0  ;;  %v1301_v29 = vld [vmem:[%s1999_s4 + $0xc4] sm:$0xf]  ;;  %v1091_v30 = vld [vmem:[%s1999_s4 + $0xc8] sm:$0xf0]  ;;  %v993_v33 = vld [vmem:[%s1999_s4] sm:$0xf]  ;;  %v1066_v36 = vor.u32 %v1296_v25, %v1065_v22  ;;  %v1014_v40 = vor.u32 %v1281_v26, %v1011_v27 }
  0x32   :  { %491 = vmatpush.bf16.msrb.mxu1 %v1038_v59  ;;  %465 = vmatpush.bf16.msra.mxu3 %v1082_v6  ;;  %v1313_v32 = vld [vmem:[%s1999_s4 + $0x124] sm:$0xf]  ;;  %v1278_v34 = vld [vmem:[%s1999_s4 + $0x4] sm:$0xf0]  ;;  %v1139_v35 = vld [vmem:[%s1999_s4 + $0x128] sm:$0x30]  ;;  %v1094_v41 = vor.u32 %v1301_v29, %v1091_v30 }
  0x33   :  { %v1057_v37 = vld [vmem:[%s1999_s4 + $0x80] sm:$0xf]  ;;  %v1142_v38 = vor.u32 %v1313_v32, %v1139_v35  ;;  %v1294_v42 = vld [vmem:[%s1999_s4 + $0x84] sm:$0xf0]  ;;  %v1279_v43 = vld [vmem:[%s1999_s4 + $0x14] sm:$0xf]  ;;  %v994_v46 = vor.u32 %v1278_v34, %v993_v33 }
  0x34   :  { %v534_v39 = vld [vmem:[#allocation2] sm:$0xff]  ;;  %v1003_v44 = vld [vmem:[%s1999_s4 + $0x18] sm:$0xf0]  ;;  %v1299_v47 = vld [vmem:[%s1999_s4 + $0xb4] sm:$0xf]  ;;  %v1058_v55 = vor.u32 %v1294_v42, %v1057_v37 }
  0x35   :  { %503 = vmatpush.bf16.msra.mxu0 %v1118_v60  ;;  %452 = vmatpush.bf16.msra.mxu2 %v1010_v14  ;;  %v536_v45 = vunpack.c.l.b16 %v534_v39  ;;  %v1083_v48 = vld [vmem:[%s1999_s4 + $0xb8] sm:$0xf0]  ;;  %v150_v49 = vld [vmem:[%s1995_s0] sm:$0xff]  ;;  %v537_v50 = vunpack.c.h.b16 %v534_v39  ;;  %v151_v52 = vld [vmem:[%s1995_s0 + $0x8] sm:$0xff]  ;;  %v445_v56 = vsel %vm440_vm2, %v1142_v38, 0  ;;  %v1006_v61 = vor.u32 %v1279_v43, %v1003_v44 }
  0x36   :  { %492 = vmatpush.bf16.msrb.mxu1 %v1030_v9  ;;  %466 = vmatpush.bf16.msra.mxu3 %v1074_v21  ;;  %v153_v51 = vld [vmem:[%s1995_s0 + $0x18] sm:$0xff]  ;;  %v154_v53 = vld [vmem:[%s1995_s0 + $0x20] sm:$0xff]  ;;  %v1311_v58 = vld [vmem:[%s1999_s4 + $0x114] sm:$0xf]  ;;  %v1086_v62 = vor.u32 %v1299_v47, %v1083_v48 }
  0x37   :  { %v538_v54 = vpack.c.b16 %v536_v45, %v536_v45  ;;  %v1277_v57 = vld [vmem:[%s1999_s4 + $0x4] sm:$0xf]  ;;  %v1131_v59 = vld [vmem:[%s1999_s4 + $0x118] sm:$0xf0]  ;;  %v584_v60 = vld [vmem:[#allocation4] sm:$0xff]  ;;  %v156_v2 = vpack.c.bf16 %v153_v51, %v150_v49  ;;  %v539_v3 = vpack.c.b16 %v537_v50, %v537_v50  ;;  %v157_v7 = vpack.c.bf16 %v154_v53, %v151_v52 }
  0x38   :  { %1143 = vmatmul.msk.bf16.vlgmr.msrb.gmra.mxu0 %vm436_vm4, %v1836_v31  ;;  %v995_v63 = vld [vmem:[%s1999_s4 + $0x8] sm:$0xf0]  ;;  %v586_v0 = vunpack.c.l.b16 %v584_v60  ;;  %v587_v1 = vunpack.c.h.b16 %v584_v60  ;;  %v1297_v5 = vld [vmem:[%s1999_s4 + $0xa4] sm:$0xf]  ;;  %v1134_v9 = vor.u32 %v1311_v58, %v1131_v59  ;;  %v1295_v17 = vld [vmem:[%s1999_s4 + $0x94] sm:$0xf] }
  0x39   :  { %504 = vmatpush.bf16.msra.mxu0 %v1110_v10  ;;  %453 = vmatpush.bf16.msra.mxu2 %v1002_v28  ;;  %v544_v4 = vand.u32 %v538_v54, %v1667_v8  ;;  %v1075_v6 = vld [vmem:[%s1999_s4 + $0xa8] sm:$0xf0]  ;;  %v1309_v11 = vld [vmem:[%s1999_s4 + $0x104] sm:$0xf]  ;;  %v998_v14 = vor.u32 %v1277_v57, %v995_v63  ;;  %v1067_v18 = vld [vmem:[%s1999_s4 + $0x98] sm:$0xf0]  ;;  %v547_v19 = vand.u32 %v539_v3, %v1667_v8 }
  0x3a   :  { %493 = vmatpush.bf16.msrb.mxu1 %v1022_v23  ;;  %467 = vmatpush.bf16.msra.mxu3 %v1066_v36  ;;  %v589_v10 = vpack.c.b16 %v587_v1, %v587_v1  ;;  %v1123_v12 = vld [vmem:[%s1999_s4 + $0x108] sm:$0xf0]  ;;  %v588_v13 = vpack.c.b16 %v586_v0, %v586_v0  ;;  %v1078_v15 = vor.u32 %v1297_v5, %v1075_v6  ;;  %v1293_v23 = vld [vmem:[%s1999_s4 + $0x84] sm:$0xf]  ;;  %v1330_v33 = vld [vmem:[%s2004_s9 + $0x78] sm:$0xff] }
  0x3b   :  { %v1126_v20 = vor.u32 %v1309_v11, %v1123_v12  ;;  %v1070_v22 = vor.u32 %v1295_v17, %v1067_v18  ;;  %v532_v26 = vld [vmem:[%s1997_s2 + $0x8] sm:$0xff]  ;;  %v581_v28 = vld [vmem:[%s1998_s3] sm:$0xff]  ;;  %v1321_v34 = vld [vmem:[%s2004_s9 + $0x30] sm:$0xff] }
  0x3c   :  { %v597_v16 = vand.u32 %v589_v10, %v1667_v8  ;;  %v594_v21 = vand.u32 %v588_v13, %v1667_v8  ;;  %v531_v8 = vld [vmem:[%s1997_s2] sm:$0xff]  ;;  %v582_v29 = vld [vmem:[%s1998_s3 + $0x8] sm:$0xff]  ;;  %v1329_v35 = vld [vmem:[%s2004_s9 + $0x70] sm:$0xff] }
  0x3d   :  { %505 = vmatpush.bf16.msra.mxu0 %v1102_v24  ;;  %454 = vmatpush.bf16.msra.mxu2 %v994_v46  ;;  %v1059_v24 = vld [vmem:[%s1999_s4 + $0x88] sm:$0xf0]  ;;  %v533_v27 = vpack.c.bf16 %v532_v26, %v531_v8  ;;  %v583_v30 = vpack.c.bf16 %v582_v29, %v581_v28  ;;  %v1318_v46 = vld [vmem:[%s2004_s9 + $0x18] sm:$0xff]  ;;  %v1317_v48 = vld [vmem:[%s2004_s9 + $0x10] sm:$0xff] }
  0x3e   :  { %494 = vmatpush.bf16.msrb.mxu1 %v1014_v40  ;;  %468 = vmatpush.bf16.msra.mxu3 %v1058_v55  ;;  %v1062_v25 = vor.u32 %v1293_v23, %v1059_v24  ;;  %v1320_v38 = vld [vmem:[%s2004_s9 + $0x28] sm:$0xff]  ;;  %v1319_v40 = vld [vmem:[%s2004_s9 + $0x20] sm:$0xff]  ;;  %v1326_v47 = vld [vmem:[%s2004_s9 + $0x58] sm:$0xff] }
  0x3f   :  { %v1328_v39 = vld [vmem:[%s2004_s9 + $0x68] sm:$0xff]  ;;  %v1325_v49 = vld [vmem:[%s2004_s9 + $0x50] sm:$0xff]  ;;  %v1323_v57 = vld [vmem:[%s2004_s9 + $0x40] sm:$0xff] }
  0x40   :  { %455 = vmatmul.bf16.vlgmr.msra.gmra.mxu2 %v156_v2  ;;  %v1316_v53 = vld [vmem:[%s2004_s9 + $0x8] sm:$0xff]  ;;  %v1336_v1 = vld [vmem:[#allocation7 + $0x28] sm:$0xff]  ;;  %v1335_v6 = vld [vmem:[#allocation7 + $0x20] sm:$0xff] }
  0x41   :  { %506 = vmatpush.bf16.msra.mxu0 %v1094_v41  ;;  %522 = vmatpush.bf16.msrb.mxu2 %v445_v56  ;;  %v1327_v41 = vld [vmem:[%s2004_s9 + $0x60] sm:$0xff]  ;;  %v1324_v54 = vld [vmem:[%s2004_s9 + $0x48] sm:$0xff] }
  0x42   :  { %495 = vmatpush.bf16.msrb.mxu1 %v1006_v61  ;;  %556 = vmatpush.bf16.msrb.mxu3 %v544_v4  ;;  %v1315_v56 = vld [vmem:[%s2004_s9] sm:$0xff]  ;;  %v1338_v60 = vld [vmem:[#allocation7 + $0x38] sm:$0xff] }
  0x43   :  { %469 = vmatmul.bf16.vlgmr.msra.gmra.mxu3 %v157_v7 }
  0x45   :  { %507 = vmatpush.bf16.msra.mxu0 %v1086_v62  ;;  %523 = vmatpush.bf16.msrb.mxu2 %v1134_v9  ;;  %v1337_v62 = vld [vmem:[#allocation7 + $0x30] sm:$0xff] }
  0x46   :  { %620 = vmatpush.bf16.msra.mxu3 %v597_v16  ;;  %496 = vmatpush.bf16.msrb.mxu1 %v998_v14 }
  0x49   :  { %508 = vmatpush.bf16.msra.mxu0 %v1078_v15  ;;  %524 = vmatpush.bf16.msrb.mxu2 %v1126_v20 }
  0x4a   :  { %570 = vmatpush.bf16.msra.mxu1 %v547_v19  ;;  %v631_v19 = vld [vmem:[#allocation6] sm:$0x3] }
  0x4b   :  { %497 = vmatmul.bf16.vlgmr.msrb.gmra.mxu1 %v156_v2  ;;  %v633_v8 = vperm.slane %v631_v19, 0 }
  0x4d   :  { %606 = vmatpush.bf16.msra.mxu2 %v594_v21  ;;  %509 = vmatpush.bf16.msra.mxu0 %v1070_v22 }
  0x4e   :  { %793 = vmatpush.bf16.msrb.mxu1 %v1330_v33 }
  0x50   :  { %1144 = vmatmul.msk.bf16.vlgmr.msrb.gmra.mxu2 %vm436_vm4, %v1836_v31  ;;  %v1322_v31 = vld [vmem:[%s2004_s9 + $0x38] sm:$0xff] }
  0x51   :  { %510 = vmatpush.bf16.msra.mxu0 %v1062_v25  ;;  %878 = vmatpush.bf16.msrb.mxu2 %v1338_v60 }
  0x52   :  { %794 = vmatpush.bf16.msrb.mxu1 %v1329_v35 }
  0x53   :  { %1145 = vmatmul.msk.bf16.vlgmr.msrb.gmra.mxu3 %vm206_vm3, %v533_v27 }
  0x54   :  { %511 = vmatmul.bf16.vlgmr.msra.gmra.mxu0 %v157_v7 }
  0x55   :  { %779 = vmatpush.bf16.msrb.mxu0 %v1322_v31  ;;  %879 = vmatpush.bf16.msrb.mxu2 %v1337_v62 }
  0x56   :  { %795 = vmatpush.bf16.msrb.mxu1 %v1328_v39 }
  0x59   :  { %780 = vmatpush.bf16.msrb.mxu0 %v1321_v34  ;;  %880 = vmatpush.bf16.msrb.mxu2 %v1336_v1  ;;  %v1341_v1 = vld [vmem:[#allocation10 + $0x10] sm:$0xff] }
  0x5a   :  { %796 = vmatpush.bf16.msrb.mxu1 %v1327_v41 }
  0x5b   :  { %1146 = vmatmul.msk.bf16.vlgmr.msra.gmra.mxu1 %vm206_vm3, %v533_v27  ;;  %v634_v27 = vperm.slane %v631_v19, 1 }
  0x5d   :  { %781 = vmatpush.bf16.msrb.mxu0 %v1320_v38  ;;  %881 = vmatpush.bf16.msrb.mxu2 %v1335_v6 }
  0x5e   :  { %797 = vmatpush.bf16.msrb.mxu1 %v1326_v47  ;;  %v1331_v47 = vld [vmem:[#allocation7] sm:$0xff] }
  0x60   :  { %1147 = vmatmul.msk.bf16.vlgmr.msra.gmra.mxu2 %vm206_vm3, %v583_v30 }
  0x61   :  { %782 = vmatpush.bf16.msrb.mxu0 %v1319_v40 }
  0x62   :  { %798 = vmatpush.bf16.msrb.mxu1 %v1325_v49  ;;  %v1345_v49 = vld [vmem:[#allocation10 + $0x30] sm:$0xff] }
  0x63   :  { %1148 = vmatmul.msk.bf16.vlgmr.msra.gmra.mxu3 %vm206_vm3, %v583_v30 }
  0x65   :  { %783 = vmatpush.bf16.msrb.mxu0 %v1318_v46  ;;  %v1332_v46 = vld [vmem:[#allocation7 + $0x8] sm:$0xff] }
  0x66   :  { %799 = vmatpush.bf16.msrb.mxu1 %v1324_v54 }
  0x69   :  { %784 = vmatpush.bf16.msrb.mxu0 %v1317_v48  ;;  %v1346_v48 = vld [vmem:[#allocation10 + $0x38] sm:$0xff] }
  0x6a   :  { %800 = vmatpush.bf16.msrb.mxu1 %v1323_v57  ;;  %963 = vmatpush.bf16.msrb.mxu3 %v1346_v48 }
  0x6d   :  { %785 = vmatpush.bf16.msrb.mxu0 %v1316_v53  ;;  %v1362_v53 = vld [vmem:[%s2005_s10] ss:$0 sm:$0xff] }
  0x6e   :  { %964 = vmatpush.bf16.msrb.mxu3 %v1345_v49 }
  0x71   :  { %786 = vmatpush.bf16.msrb.mxu0 %v1315_v56 }
  0xa5   :  { %v229_v32 = vpop.f32.mrf.mxu0 }
  0xa8   :  { %v243_v36 = vpop.f32.mrf.mxu1 }
  0xad   :  { %v231_v37 = vpop.f32.mrf.mxu0 }
  0xb0   :  { %v245_v42 = vpop.f32.mrf.mxu1 }
  0xb5   :  { %v484_v44 = vpop.f32.mrf.mxu0 }
  0xbd   :  { %v486_v55 = vpop.f32.mrf.mxu0 }
  0xc3   :  { %v456_v43 = vpop.f32.mrf.mxu2 }
  0xc4   :  { %v457_v2 = vadd.f32 %v456_v43, %v229_v32 }
  0xc6   :  { %v470_v45 = vpop.f32.mrf.mxu3 }
  0xc7   :  { %v471_v7 = vadd.f32 %v470_v45, %v457_v2  ;;  %v1333_v45 = vld [vmem:[#allocation7 + $0x10] sm:$0xff] }
  0xc8   :  { %v498_v51 = vpop.f32.mrf.mxu1  ;;  %v1340_v2 = vld [vmem:[#allocation10 + $0x8] sm:$0xff] }
  0xc9   :  { %v499_v5 = vadd.f32 %v498_v51, %v243_v36  ;;  %v485_v16 = vadd.f32 %v484_v44, %v471_v7  ;;  %v1334_v44 = vld [vmem:[#allocation7 + $0x18] sm:$0xff]  ;;  %v1343_v51 = vld [vmem:[#allocation10 + $0x20] sm:$0xff] }
  0xca   :  { %882 = vmatpush.bf16.msrb.mxu2 %v1334_v44 }
  0xcb   :  { %v458_v50 = vpop.f32.mrf.mxu2 }
  0xcc   :  { %v459_v9 = vadd.f32 %v458_v50, %v231_v37  ;;  %v1344_v50 = vld [vmem:[#allocation10 + $0x28] sm:$0xff] }
  0xcd   :  { %965 = vmatpush.bf16.msrb.mxu3 %v1344_v50 }
  0xce   :  { %v472_v52 = vpop.f32.mrf.mxu3  ;;  %883 = vmatpush.bf16.msrb.mxu2 %v1333_v45 }
  0xcf   :  { %v473_v15 = vadd.f32 %v472_v52, %v459_v9 }
  0xd0   :  { %v500_v61 = vpop.f32.mrf.mxu1 }
  0xd1   :  { %v512_v63 = vpop.f32.mrf.mxu0  ;;  %v501_v12 = vadd.f32 %v500_v61, %v245_v42  ;;  %v487_v23 = vadd.f32 %v486_v55, %v473_v15  ;;  %966 = vmatpush.bf16.msrb.mxu3 %v1343_v51 }
  0xd2   :  { %v513_v10 = vadd.f32 %v512_v63, %v499_v5  ;;  %884 = vmatpush.bf16.msrb.mxu2 %v1332_v46  ;;  %v1363_v5 = vld [vmem:[#allocation9] ss:$0 sm:$0xff] }
  0xd3   :  { %v526_v58 = vpop.f32.mrf.mxu2 }
  0xd4   :  { %v527_v13 = vadd.f32 %v526_v58, %v513_v10 }
  0xd6   :  { %v558_v59 = vpop.f32.mrf.mxu3  ;;  %885 = vmatpush.bf16.msrb.mxu2 %v1331_v47 }
  0xd7   :  { %v577_v20 = vadd.f32 %v558_v59, %v485_v16 }
  0xd8   :  { %v572_v4 = vpop.f32.mrf.mxu1 }
  0xd9   :  { %v514_v11 = vpop.f32.mrf.mxu0  ;;  %v578_v21 = vadd.f32 %v572_v4, %v527_v13 }
  0xda   :  { %v515_v18 = vadd.f32 %v514_v11, %v501_v12 }
  0xdb   :  { %v528_v0 = vpop.f32.mrf.mxu2 }
  0xdc   :  { %v529_v22 = vadd.f32 %v528_v0, %v515_v18  ;;  %v1342_v0 = vld [vmem:[#allocation10 + $0x18] sm:$0xff] }
  0xdd   :  { %967 = vmatpush.bf16.msrb.mxu3 %v1342_v0 }
  0xde   :  { %v560_v3 = vpop.f32.mrf.mxu3 }
  0xdf   :  { %v579_v28 = vadd.f32 %v560_v3, %v487_v23  ;;  %v1339_v3 = vld [vmem:[#allocation10] sm:$0xff] }
  0xe0   :  { %v574_v24 = vpop.f32.mrf.mxu1 }
  0xe1   :  { %v580_v29 = vadd.f32 %v574_v24, %v529_v22  ;;  %968 = vmatpush.bf16.msrb.mxu3 %v1341_v1 }
  0xe3   :  { %v608_v14 = vpop.f32.mrf.mxu2 }
  0xe4   :  { %v627_v25 = vadd.f32 %v608_v14, %v577_v20  ;;  %v1364_v14 = vld [vmem:[#allocation12] ss:$0 sm:$0xff] }
  0xe5   :  { %969 = vmatpush.bf16.msrb.mxu3 %v1340_v2 }
  0xe6   :  { %v622_v17 = vpop.f32.mrf.mxu3  ;;  %v637_v32 = vadd.f32 %v633_v8, %v627_v25 }
  0xe7   :  { %v628_v26 = vadd.f32 %v622_v17, %v578_v21 }
  0xe8   :  { %v641_v38 = vmax.f32 %v637_v32, 0.0 }
  0xe9   :  { %v638_v34 = vadd.f32 %v634_v27, %v628_v26  ;;  %970 = vmatpush.bf16.msrb.mxu3 %v1339_v3 }
  0xeb   :  { %v610_v30 = vpop.f32.mrf.mxu2  ;;  %v642_v40 = vmax.f32 %v638_v34, 0.0 }
  0xec   :  { %v629_v31 = vadd.f32 %v610_v30, %v579_v28 }
  0xee   :  { %v624_v33 = vpop.f32.mrf.mxu3  ;;  %v639_v36 = vadd.f32 %v633_v8, %v629_v31 }
  0xef   :  { %v630_v35 = vadd.f32 %v624_v33, %v580_v29 }
  0xf0   :  { %v643_v39 = vmax.f32 %v639_v36, 0.0 }
  0xf1   :  { %v640_v37 = vadd.f32 %v634_v27, %v630_v35 }
  0xf2   :  { %v645_v42 = vpack.c.bf16 %v643_v39, %v641_v38 }
  0xf3   :  { %v644_v41 = vmax.f32 %v640_v37, 0.0 }
  0xf4   :  { %787 = vmatmul.bf16.vlgmr.msrb.gmra.mxu0 %v645_v42 }
  0xf5   :  { %v646_v43 = vpack.c.bf16 %v644_v41, %v642_v40 }
  0xf7   :  { %801 = vmatmul.bf16.vlgmr.msrb.gmra.mxu1 %v646_v43 }
 0x171   :  { %v788_v52 = vpop.f32.mrf.mxu0 }
 0x172   :  { %v789_v55 = vadd.f32 %v1362_v53, %v788_v52 }
 0x174   :  { %v802_v54 = vpop.f32.mrf.mxu1 }
 0x175   :  { %v803_v57 = vadd.f32 %v802_v54, %v789_v55 }
 0x177   :  { %v807_v61 = vmax.f32 %v803_v57, 0.0 }
 0x179   :  { %v790_v56 = vpop.f32.mrf.mxu0 }
 0x17a   :  { %v791_v58 = vadd.f32 %v1362_v53, %v790_v56 }
 0x17c   :  { %v804_v59 = vpop.f32.mrf.mxu1 }
 0x17d   :  { %v805_v60 = vadd.f32 %v804_v59, %v791_v58 }
 0x17f   :  { %v808_v62 = vmax.f32 %v805_v60, 0.0 }
 0x181   :  { %v809_v63 = vpack.c.bf16 %v808_v62, %v807_v61 }
 0x183   :  { %886 = vmatmul.bf16.vlgmr.msrb.gmra.mxu2 %v809_v63 }
 0x206   :  { %v887_v4 = vpop.f32.mrf.mxu2 }
 0x207   :  { %v888_v6 = vadd.f32 %v1363_v5, %v887_v4 }
 0x209   :  { %v892_v10 = vmax.f32 %v888_v6, 0.0 }
 0x20e   :  { %v889_v7 = vpop.f32.mrf.mxu2 }
 0x20f   :  { %v890_v9 = vadd.f32 %v1363_v5, %v889_v7 }
 0x211   :  { %v893_v11 = vmax.f32 %v890_v9, 0.0 }
 0x213   :  { %v894_v12 = vpack.c.bf16 %v893_v11, %v892_v10 }
 0x215   :  { %971 = vmatmul.bf16.vlgmr.msrb.gmra.mxu3 %v894_v12 }
 0x298   :  { %v972_v13 = vpop.f32.mrf.mxu3 }
 0x299   :  { %v973_v16 = vadd.f32 %v1364_v14, %v972_v13 }
 0x2a0   :  { %v974_v15 = vpop.f32.mrf.mxu3 }
 0x2a1   :  { %v975_v17 = vadd.f32 %v1364_v14, %v974_v15 }
 0x2a3   :  { %v1350_v18 = vpack.c.bf16 %v975_v17, %v973_v16 }
 0x2a5   :  { %1351 = vst [vmem:[%s2010_s15] sm:$0xff] %v1350_v18  }
 0x2a6   :  { %985 = vsyncpa [#allocation3], 1 }
 0x2a7   :  { %986 = vsyncpa [#allocation5], 1 }
 0x2a8   :  { %987 = vsyncpa [#allocation8], 1 }
 0x2a9   :  { %988 = vsyncpa [#allocation11], 1 }

</bundles_post_ra>
